<compile_context>
chip_gen: v5e
topology: v5e:2x2
jax: 0.10.0
libtpu: 0.0.40
codegen_flags: <defaults>
</compile_context>

<pallas_src>
import jax
import jax.numpy as jnp
from jax.experimental import pallas as pl
from jax.experimental.pallas import tpu as pltpu


def id_copy(x):
    """Materialize a fresh buffer equal to x via a direct HBM->HBM DMA."""
    if x.size == 0:
        return x

    orig_shape = x.shape
    # 2-D view so chunking along the leading axis is well defined. For a
    # contiguous array this reshape is layout-trivial.
    flat = x.reshape(1, -1) if x.ndim < 2 else x.reshape(x.shape[0], -1)
    rows, cols = flat.shape
    itemsize = flat.dtype.itemsize
    total_bytes = flat.size * itemsize

    # Keep a few DMAs in flight for large arrays (>= ~1 MiB per chunk);
    # small arrays use a single DMA.
    n_chunks = 1
    for c in (8, 4, 2):
        if rows % c == 0 and total_bytes // c >= (1 << 20):
            n_chunks = c
            break
    chunk_rows = rows // n_chunks

    def _id_dma_kernel(x_hbm, o_hbm, sems):
        copies = []
        for i in range(n_chunks):
            lo = i * chunk_rows
            hi = lo + chunk_rows
            cp = pltpu.make_async_copy(
                x_hbm.at[lo:hi, :],
                o_hbm.at[lo:hi, :],
                sems.at[i],
            )
            cp.start()
            copies.append(cp)
        for cp in copies:
            cp.wait()

    out = pl.pallas_call(
        _id_dma_kernel,
        out_shape=jax.ShapeDtypeStruct(flat.shape, flat.dtype),
        in_specs=[pl.BlockSpec(memory_space=pl.ANY)],
        out_specs=pl.BlockSpec(memory_space=pl.ANY),
        scratch_shapes=[pltpu.SemaphoreType.DMA((n_chunks,))],
        cost_estimate=pl.CostEstimate(
            flops=0, transcendentals=0, bytes_accessed=2 * total_bytes
        ),
    )(flat)
    return out.reshape(orig_shape)


def id_forward(x, copy=False):
    """Identity forward pass.

    Default is the zero-cost path (return x unchanged — no kernel, no HBM
    traffic). Pass copy=True only if a distinct output buffer is required;
    that path is a single HBM->HBM DMA pallas_call.
    """
    if not copy:
        return x
    return id_copy(x)


if __name__ == "__main__":
    key = jax.random.PRNGKey(0)
    x = jax.random.normal(key, (2, 4, 16, 16), dtype=jnp.float32)

    # Zero-cost identity path (the recommended default).
    y0 = id_forward(x)
    y0 = jax.block_until_ready(y0)
    assert y0.shape == x.shape and y0.dtype == x.dtype
    assert bool(jnp.array_equal(y0, x))

    # Materialized-copy path: exercises the Pallas HBM->HBM DMA kernel.
    y1 = id_forward(x, copy=True)
    y1 = jax.block_until_ready(y1)
    assert y1.shape == x.shape and y1.dtype == x.dtype
    assert bool(jnp.array_equal(y1, x))

    # Awkward shape / sub-32-bit dtype: DMA path has no tiling constraints.
    x2 = jax.random.normal(jax.random.PRNGKey(1), (3, 5, 7)).astype(jnp.bfloat16)
    y2 = jax.block_until_ready(id_copy(x2))
    assert y2.shape == x2.shape and y2.dtype == x2.dtype
    assert bool(jnp.array_equal(y2, x2))

    print("KERNEL_OK")
</pallas_src>

<mosaic_0001>
module attributes {stable_mosaic.version = 11 : i64} {
  func.func @_id_dma_kernel(%arg0: memref<2x1024xf32, #tpu.memory_space<any>>, %arg1: memref<2x1024xf32, #tpu.memory_space<any>>, %arg2: memref<1x!tpu.dma_semaphore, #tpu.memory_space<semaphore_mem>>) attributes {dimension_semantics = [], scalar_prefetch = 0 : i64, scratch_operands = 1 : i64, tpu.core_type = #tpu.core_type<tc>} {
    %c0_i32 = arith.constant 0 : i32
    %c0_i32_0 = arith.constant 0 : i32
    %c0_i32_1 = arith.constant 0 : i32
    %0 = tpu.memref_slice %arg0[%c0_i32_0, %c0_i32_1] : memref<2x1024xf32, #tpu.memory_space<any>> -> memref<2x1024xf32, #tpu.memory_space<any>>
    %c0_i32_2 = arith.constant 0 : i32
    %c0_i32_3 = arith.constant 0 : i32
    %1 = tpu.memref_slice %arg1[%c0_i32_2, %c0_i32_3] : memref<2x1024xf32, #tpu.memory_space<any>> -> memref<2x1024xf32, #tpu.memory_space<any>>
    %2 = tpu.memref_slice %arg2[%c0_i32] : memref<1x!tpu.dma_semaphore, #tpu.memory_space<semaphore_mem>> -> memref<1x!tpu.dma_semaphore, #tpu.memory_space<semaphore_mem>>
    %3 = tpu.memref_squeeze %2 : memref<1x!tpu.dma_semaphore, #tpu.memory_space<semaphore_mem>> -> memref<!tpu.dma_semaphore, #tpu.memory_space<semaphore_mem>>
    tpu.enqueue_dma source(%0 : memref<2x1024xf32, #tpu.memory_space<any>>) target(%1 : memref<2x1024xf32, #tpu.memory_space<any>>) target_semaphore(%3 : memref<!tpu.dma_semaphore, #tpu.memory_space<semaphore_mem>>)
    %c0_i32_4 = arith.constant 0 : i32
    %c0_i32_5 = arith.constant 0 : i32
    %c0_i32_6 = arith.constant 0 : i32
    %4 = tpu.memref_slice %arg0[%c0_i32_5, %c0_i32_6] : memref<2x1024xf32, #tpu.memory_space<any>> -> memref<2x1024xf32, #tpu.memory_space<any>>
    %c0_i32_7 = arith.constant 0 : i32
    %c0_i32_8 = arith.constant 0 : i32
    %5 = tpu.memref_slice %arg1[%c0_i32_7, %c0_i32_8] : memref<2x1024xf32, #tpu.memory_space<any>> -> memref<2x1024xf32, #tpu.memory_space<any>>
    %6 = tpu.memref_slice %arg2[%c0_i32_4] : memref<1x!tpu.dma_semaphore, #tpu.memory_space<semaphore_mem>> -> memref<1x!tpu.dma_semaphore, #tpu.memory_space<semaphore_mem>>
    %7 = tpu.memref_squeeze %6 : memref<1x!tpu.dma_semaphore, #tpu.memory_space<semaphore_mem>> -> memref<!tpu.dma_semaphore, #tpu.memory_space<semaphore_mem>>
    tpu.wait_dma2 semaphore(%7 : memref<!tpu.dma_semaphore, #tpu.memory_space<semaphore_mem>>) src(%4 : memref<2x1024xf32, #tpu.memory_space<any>>) dst(%5 : memref<2x1024xf32, #tpu.memory_space<any>>)
    return
  }
}

</mosaic_0001>

<bundles_post_ra>
// kernel: tpu_custom_call.1
= control target key start
LH: loop header
LB: loop body
LE: loop exit
PB: predicated region body
PF: predicated region fallthrough
CT: control target
= control target key end

     0   :  { %s33_s12 = smov [#allocation2]   ;;  %s34_s13 = smov [#allocation3]   ;;  %s52_s0 = inlined_call_operand.hbm [shape: f32[2,1024], index: 0, kind: input, shape index: {}]   ;;  %s53_s1 = inlined_call_operand.hbm [shape: f32[2,1024], index: 1, kind: output, shape index: {}]  }
   0x1   :  { %s10_s8 = sshll.u32 %s52_s0, 4  ;;  %s12_s11 = sshll.u32 %s53_s1, 4  ;;  %s11_s8 = int_to_ptr.hbm [resolvable:$true] %s10_s8  ;;  %s13_s11 = int_to_ptr.hbm [resolvable:$true] %s12_s11 }
   0x2   :  { %s35_s14 = smov 0  }
   0x3   :  { %16 = dma.general %s11_s8, 256, %s13_s11, %s33_s12, %s34_s13, [#allocation4], %s35_s14, 0  }
   0x4   :  { %31 = dma.done.wait [#allocation2], 256 }
   0x5   :  { %32 = vsyncadd [#allocation2], 4294967040 }
   0x6   :  { %21 = vsyncmov [#allocation2] }
   0x9   :  { %s22_s15 = vpop.sfrf %21 }
   0xa   :  { %p27_p0 = scmp.ne.s32.totalorder %s22_s15, 0 }
   0xc   :  { %26 = shalt.err (%p27_p0)  }

</bundles_post_ra>
